<compile_context>
chip_gen: v5e
topology: v5e:2x2
jax: 0.10.0
libtpu: 0.0.40
codegen_flags: <defaults>
</compile_context>

<pallas_src>
import jax
import jax.numpy as jnp
from jax.experimental import pallas as pl
from jax.experimental.pallas import tpu as pltpu


_LANE = 128


def _round_up(x, m):
    return ((x + m - 1) // m) * m


def _detect_tpu_generation():
    """Best-effort TPU generation from device_kind; 0 means unknown."""
    try:
        kind = jax.devices()[0].device_kind.lower()
    except Exception:
        return 0
    for gen in (7, 6, 5, 4):
        if ("v{}".format(gen) in kind) or ("{}x".format(gen) in kind) or ("{}e".format(gen) in kind):
            return gen
    return 0


def _vmem_plan(batch, feat, itemsize):
    """Pick (bt, tf): rows per block and lanes per block."""
    gen = _detect_tpu_generation()
    if gen >= 7:
        target_block_bytes = 10 * 1024 * 1024   # amortize ~0.35us/step @ 3.2 TB/s
        budget_bytes = 24 * 1024 * 1024         # default scoped limit is 32 MiB
    elif gen == 6:
        target_block_bytes = 8 * 1024 * 1024
        budget_bytes = 24 * 1024 * 1024         # default scoped limit is 32 MiB
    else:                                        # v5e / unknown: conservative
        target_block_bytes = 4 * 1024 * 1024
        budget_bytes = 12 * 1024 * 1024         # default scoped limit is 16 MiB

    # Native sublane packing: 8 rows (f32), 16 (bf16), 32 (i8/fp8).
    sub_mult = max(8, (8 * 4) // itemsize)

    row_bytes = feat * itemsize
    min_rows = batch if batch <= sub_mult else sub_mult

    # VMEM model: 2x-buffered (bt, tf) output + 2x-buffered (1, tf) constant.
    if 2 * (min_rows + 1) * row_bytes > budget_bytes:
        # Feature row too large for even the minimal bt: split the lane axis.
        tf = (budget_bytes // (2 * (min_rows + 1) * itemsize)) // _LANE * _LANE
        tf = max(_LANE, tf)
        return min_rows, tf

    tf = feat
    bt_budget = max(1, budget_bytes // (2 * row_bytes) - 1)
    rows = max(1, min(target_block_bytes // row_bytes, bt_budget))

    if rows >= batch:
        # Whole output fits in one block: still split into two balanced
        # "parallel" chunks so both v7x TensorCores get work (harmless on
        # single-TC v5e/v6e).
        if batch > sub_mult:
            return _round_up(pl.cdiv(batch, 2), sub_mult), tf
        return batch, tf                          # full dim -> always legal

    bt = max(sub_mult, (rows // sub_mult) * sub_mult)
    # Even out odd grids (>2 steps) so the 2-TC split on v7x stays balanced.
    n = pl.cdiv(batch, bt)
    if n > 2 and n % 2 == 1:
        bt2 = _round_up(pl.cdiv(batch, n + 1), sub_mult)
        if bt2 >= sub_mult:
            bt = bt2
    return bt, tf


def _broadcast_kernel(const_ref, out_ref):
    # const_ref: (1, TF)  -- slice of the flattened learned constant.
    # out_ref:   (BT, TF) -- lane-dense output chunk covering BT batch rows.
    out_ref[...] = jnp.broadcast_to(const_ref[...], out_ref.shape)


def constant_input_forward(x, const):
    """Pallas equivalent of ConstantInput.forward.

    x:     any array whose leading dim is the batch size (values unused).
    const: (1, C, S, S) learned constant.
    returns: (B, C, S, S) = const repeated along the batch dim.
    """
    batch = x.shape[0]
    _, c, s1, s2 = const.shape
    feat = c * s1 * s2
    itemsize = jnp.dtype(const.dtype).itemsize

    # A flattened row that is not a 128-lane multiple would force masked
    # vst.msk partial stores; this only happens for toy-sized constants where
    # the pallas_call fixed cost dominates anyway, so let XLA fuse it.
    if feat % _LANE != 0:
        return jnp.broadcast_to(const, (batch, c, s1, s2))

    const2d = const.reshape(1, feat)              # metadata-only reshape
    bt, tf = _vmem_plan(batch, feat, itemsize)
    grid = (pl.cdiv(batch, bt), pl.cdiv(feat, tf))

    out2d = pl.pallas_call(
        _broadcast_kernel,
        out_shape=jax.ShapeDtypeStruct((batch, feat), const.dtype),
        grid_spec=pltpu.PrefetchScalarGridSpec(
            num_scalar_prefetch=0,
            grid=grid,
            in_specs=[
                # Same (1, tf) constant slice for every batch chunk.
                pl.BlockSpec((1, tf), lambda b, f: (0, f)),
            ],
            out_specs=pl.BlockSpec((bt, tf), lambda b, f: (b, f)),
        ),
        compiler_params=pltpu.CompilerParams(
            dimension_semantics=("parallel", "parallel"),
        ),
        cost_estimate=pl.CostEstimate(
            flops=0,
            transcendentals=0,
            bytes_accessed=(batch * feat + feat) * itemsize,
        ),
    )(const2d)

    return out2d.reshape(batch, c, s1, s2)


if __name__ == "__main__":
    key = jax.random.PRNGKey(0)
    k_const, k_x = jax.random.split(key)

    # Small shapes; feat = C*S*S = 512 is a 128-lane multiple -> kernel path.
    channel, size = 32, 4
    batch, style_dim = 2, 32

    # Deterministic "learned" constant, matching nn.Parameter(torch.randn(1,C,S,S)).
    const = jax.random.normal(k_const, (1, channel, size, size), dtype=jnp.float32)
    # Latent input: only its batch dim matters for this module.
    x = jax.random.normal(k_x, (batch, style_dim), dtype=jnp.float32)

    out = constant_input_forward(x, const)
    out = jax.block_until_ready(out)

    ref = jnp.broadcast_to(const, (batch, channel, size, size))
    assert out.shape == (batch, channel, size, size)
    assert out.dtype == const.dtype
    assert bool(jnp.array_equal(out, ref))

    # Toy constant (feat=64, not a 128 multiple) exercises the XLA fallback.
    const_small = jax.random.normal(k_const, (1, 4, 4, 4), dtype=jnp.float32)
    out_small = jax.block_until_ready(constant_input_forward(x, const_small))
    assert bool(jnp.array_equal(out_small,
                                jnp.broadcast_to(const_small, (batch, 4, 4, 4))))

    print("KERNEL_OK")
</pallas_src>

<mosaic_0001>
module attributes {stable_mosaic.version = 11 : i64} {
  func.func @_broadcast_kernel(%arg0: i32, %arg1: i32, %arg2: memref<1x512xf32, #tpu.memory_space<vmem>>, %arg3: memref<2x512xf32, #tpu.memory_space<vmem>>) attributes {dimension_semantics = [#tpu.dimension_semantics<parallel>, #tpu.dimension_semantics<parallel>], iteration_bounds = array<i64: 1, 1>, scalar_prefetch = 0 : i64, scratch_operands = 0 : i64, tpu.core_type = #tpu.core_type<tc>, window_params = [{transform_indices = @transform_0, window_bounds = array<i64: 1, 512>}, {transform_indices = @transform_1, window_bounds = array<i64: 2, 512>}]} {
    %c0 = arith.constant 0 : index
    %c0_0 = arith.constant 0 : index
    %0 = vector.load %arg2[%c0, %c0_0] : memref<1x512xf32, #tpu.memory_space<vmem>>, vector<1x512xf32>
    %1 = vector.shape_cast %0 : vector<1x512xf32> to vector<1x512xf32>
    %2 = vector.broadcast %1 : vector<1x512xf32> to vector<2x512xf32>
    %c0_1 = arith.constant 0 : index
    %c0_2 = arith.constant 0 : index
    %3 = vector.load %arg3[%c0_1, %c0_2] : memref<2x512xf32, #tpu.memory_space<vmem>>, vector<2x512xf32>
    tpu.vector_store %arg3[%c0_1, %c0_2], %2 {strides = array<i32>} : memref<2x512xf32, #tpu.memory_space<vmem>>, vector<2x512xf32>,
    return
  }
  func.func @transform_0(%arg0: i32, %arg1: i32) -> (i32, i32) {
    %c0_i32 = arith.constant 0 : i32
    %c0_i32_0 = arith.constant 0 : i32
    return %c0_i32, %arg1 : i32, i32
  }
  func.func @transform_1(%arg0: i32, %arg1: i32) -> (i32, i32) {
    %c0_i32 = arith.constant 0 : i32
    return %arg0, %arg1 : i32, i32
  }
}

</mosaic_0001>

<bundles_post_ra>
// kernel: tpu_custom_call.1
= control target key start
LH: loop header
LB: loop body
LE: loop exit
PB: predicated region body
PF: predicated region fallthrough
CT: control target
= control target key end

     0   :  { %6 = vsyncpa [#allocation3], 0  ;;  %s129_s0 = inlined_call_operand.hbm [shape: f32[1,512], index: 0, kind: input, shape index: {}]   ;;  %s130_s1 = inlined_call_operand.hbm [shape: f32[2,512], index: 1, kind: output, shape index: {}]  }
   0x1   :  { %7 = vsyncpa [#allocation4], 0  ;;  %s13_s8 = sshll.u32 %s129_s0, 4  ;;  %s111_s9 = smov [#allocation2]   ;;  %s14_s8 = int_to_ptr.hbm [resolvable:$true] %s13_s8 }
   0x2   :  { %s15_s10 = sshll.u32 %s111_s9, 4  ;;  %s16_s10 = int_to_ptr.vmem [resolvable:$true] %s15_s10 }
   0x3   :  { %18 = dma.hbm_to_vmem [thread:$0]  %s14_s8, 64, %s16_s10, [#allocation3]  }
   0x4   :  { %107 = dma.done.wait [#allocation3], 64  }
   0x5   :  { %108 = vsyncadd [#allocation3], 4294967232  ;;  %v23_v0 = vld [vmem:[#allocation2] sm:$0xf]  ;;  %vm32_vm0 = vcmask 1041408   ;;  %vm34_vm1 = vcmask 1045508  }
   0x6   :  { %v25_v1 = vperm.slane %v23_v0, 0  ;;  %v26_v2 = vperm.slane %v23_v0, 1  ;;  %v27_v3 = vperm.slane %v23_v0, 2  ;;  %v28_v4 = vperm.slane %v23_v0, 3  ;;  %s112_s11 = smov [#allocation5]   ;;  %s47_s0 = sshll.u32 %s130_s1, 4  ;;  %s48_s0 = int_to_ptr.hbm [resolvable:$true] %s47_s0 }
   0x7   :  { %s45_s12 = sshll.u32 %s112_s11, 4  ;;  %vm36_vm2 = vcmask 1043456   ;;  %s46_s12 = int_to_ptr.vmem [resolvable:$true] %s45_s12 }
   0x8   :  { %v29_v5 = vrot.slane %v26_v2, 6  ;;  %v30_v6 = vrot.slane %v27_v3, 4  ;;  %v31_v7 = vrot.slane %v28_v4, 2 }
   0xa   :  { %v33_v8 = vsel %vm32_vm0, %v25_v1, %v29_v5  ;;  %v35_v9 = vsel %vm34_vm1, %v30_v6, %v31_v7 }
   0xb   :  { %v37_v10 = vsel %vm36_vm2, %v33_v8, %v35_v9 }
   0xc   :  { %39 = vst [vmem:[#allocation5] sm:$0xff] %v37_v10 }
   0xd   :  { %50 = dma.vmem_to_hbm [thread:$0]  %s46_s12, 128, %s48_s0, [#allocation4]  }
   0xe   :  { %109 = dma.done.wait [#allocation4], 128  }
   0xf   :  { %110 = vsyncadd [#allocation4], 4294967168 }
  0x10   :  { %55 = vsyncpa [#allocation3], 1 }
  0x11   :  { %56 = vsyncpa [#allocation4], 1 }

</bundles_post_ra>
